<compile_context>
chip_gen: v7x
topology: tpu7x:2x2x1
jax: 0.10.0
libtpu: 0.0.40
codegen_flags: <defaults>
</compile_context>

<pallas_src>
import math

import jax
import jax.numpy as jnp
from jax.experimental import pallas as pl
from jax.experimental.pallas import tpu as pltpu


def _attention_kernel(we_ref, ls_ref, w1e_ref, w1s_ref, b1_ref, w2_ref,
                      b2_ref, o_ref):
    # we_ref : [TB, E]   ls_ref : [TB, S]
    # w1e_ref: [E, H]    w1s_ref: [S, H]    b1_ref: [1, H]
    # w2_ref : [1, H]    b2_ref : [1, 1] (SMEM scalar)
    # o_ref  : [TB, 1]

    # fc1 over the (virtually) concatenated input, expressed as a split
    # matmul so no [B, E+S] concat buffer ever touches HBM.
    h = jnp.dot(we_ref[...], w1e_ref[...], preferred_element_type=jnp.float32)
    h = h + jnp.dot(ls_ref[...], w1s_ref[...],
                    preferred_element_type=jnp.float32)
    h = jnp.tanh(h + b1_ref[...])

    # dropout(p=0.25) -> identity in eval mode.

    # fc2 + sigmoid: w2 is lane-aligned [1, H]; broadcast-multiply + lane
    # reduce runs on VPU/XLU instead of a single-column MXU matmul.
    logit = jnp.sum(h * w2_ref[...], axis=-1, keepdims=True) + b2_ref[0, 0]
    o_ref[...] = jax.nn.sigmoid(logit).astype(o_ref.dtype)


def attention_module_forward(word_embed, last_state, params, *, tile_b=256):
    """Pallas implementation of AttentionModule.forward (eval mode).

    params = (w1e [E,H], w1s [S,H], b1 [1,H], w2 [1,H], b2 [1,1])
    """
    w1e, w1s, b1, w2, b2 = params
    B, E = word_embed.shape
    S = last_state.shape[1]
    H = b1.shape[1]

    args = (word_embed, last_state, w1e, w1s, b1, w2, b2)
    out_shape = jax.ShapeDtypeStruct((B, 1), jnp.float32)

    if B % tile_b == 0 and B // tile_b >= 2:
        # Large-batch path: tile the batch axis and let v7x's two TensorCores
        # each take a share of the grid ("parallel"). Per-tile VMEM footprint
        # is only a few hundred KiB, comfortably inside v7x's 64 MiB VMEM
        # even with double buffering.
        grid = (B // tile_b,)
        return pl.pallas_call(
            _attention_kernel,
            out_shape=out_shape,
            grid=grid,
            in_specs=[
                pl.BlockSpec((tile_b, E), lambda i: (i, 0)),
                pl.BlockSpec((tile_b, S), lambda i: (i, 0)),
                pl.BlockSpec((E, H), lambda i: (0, 0)),
                pl.BlockSpec((S, H), lambda i: (0, 0)),
                pl.BlockSpec((1, H), lambda i: (0, 0)),
                pl.BlockSpec((1, H), lambda i: (0, 0)),
                pl.BlockSpec(memory_space=pltpu.MemorySpace.SMEM),  # b2 scalar
            ],
            out_specs=pl.BlockSpec((tile_b, 1), lambda i: (i, 0)),
            compiler_params=pltpu.CompilerParams(
                dimension_semantics=("parallel",)),
        )(*args)

    # Small-batch path: no grid -> no per-step pipeline overhead, no double
    # buffering; every operand sits whole in VMEM (b2 in SMEM).
    return pl.pallas_call(
        _attention_kernel,
        out_shape=out_shape,
        in_specs=[
            pl.BlockSpec(memory_space=pltpu.MemorySpace.VMEM),
            pl.BlockSpec(memory_space=pltpu.MemorySpace.VMEM),
            pl.BlockSpec(memory_space=pltpu.MemorySpace.VMEM),
            pl.BlockSpec(memory_space=pltpu.MemorySpace.VMEM),
            pl.BlockSpec(memory_space=pltpu.MemorySpace.VMEM),
            pl.BlockSpec(memory_space=pltpu.MemorySpace.VMEM),
            pl.BlockSpec(memory_space=pltpu.MemorySpace.SMEM),      # b2 scalar
        ],
        out_specs=pl.BlockSpec(memory_space=pltpu.MemorySpace.VMEM),
    )(*args)


def init_params(key, embedding_dim, state_dim, hidden_dim):
    """Matches AttentionModule.reset_parameters: uniform(-stdv, stdv),
    stdv = 1/sqrt(hidden_dim).  W1 is stored pre-split (rows for word_embed
    and rows for last_state) and pre-transposed to [in, out]; W2 is stored
    lane-aligned as [1, H]."""
    stdv = 1.0 / math.sqrt(hidden_dim)
    k1, k2, k3, k4, k5 = jax.random.split(key, 5)
    w1e = jax.random.uniform(k1, (embedding_dim, hidden_dim), jnp.float32,
                             -stdv, stdv)
    w1s = jax.random.uniform(k2, (state_dim, hidden_dim), jnp.float32,
                             -stdv, stdv)
    b1 = jax.random.uniform(k3, (1, hidden_dim), jnp.float32, -stdv, stdv)
    w2 = jax.random.uniform(k4, (1, hidden_dim), jnp.float32, -stdv, stdv)
    b2 = jax.random.uniform(k5, (1, 1), jnp.float32, -stdv, stdv)
    return (w1e, w1s, b1, w2, b2)


def _reference(word_embed, last_state, params):
    """Pure-JAX eval-mode forward, written exactly like the PyTorch module
    (explicit concat + combined W1) to check the split-matmul kernel."""
    w1e, w1s, b1, w2, b2 = params
    x = jnp.concatenate([word_embed, last_state], axis=1)
    w1 = jnp.concatenate([w1e, w1s], axis=0)
    h = jnp.tanh(x @ w1 + b1)
    return jax.nn.sigmoid(h @ w2.T + b2)


if __name__ == "__main__":
    batch = 8
    embedding_dim = 16
    state_dim = 32
    hidden_dim = 32

    key = jax.random.PRNGKey(0)
    k_we, k_ls, k_p, k_we2, k_ls2 = jax.random.split(key, 5)
    params = init_params(k_p, embedding_dim, state_dim, hidden_dim)

    # --- small batch: grid-less path ---
    word_embed = jax.random.normal(k_we, (batch, embedding_dim), jnp.float32)
    last_state = jax.random.normal(k_ls, (batch, state_dim), jnp.float32)
    out = attention_module_forward(word_embed, last_state, params)
    jax.block_until_ready(out)
    ref = _reference(word_embed, last_state, params)
    assert out.shape == (batch, 1)
    assert jnp.allclose(out, ref, atol=1e-5, rtol=1e-5)

    # --- larger batch: batch-tiled, megacore-parallel path ---
    big_batch = 1024
    we_b = jax.random.normal(k_we2, (big_batch, embedding_dim), jnp.float32)
    ls_b = jax.random.normal(k_ls2, (big_batch, state_dim), jnp.float32)
    out_b = attention_module_forward(we_b, ls_b, params, tile_b=256)
    jax.block_until_ready(out_b)
    ref_b = _reference(we_b, ls_b, params)
    assert out_b.shape == (big_batch, 1)
    assert jnp.allclose(out_b, ref_b, atol=1e-5, rtol=1e-5)

    print("KERNEL_OK")
</pallas_src>

<mosaic_0001>
module attributes {stable_mosaic.version = 11 : i64} {
  func.func @_attention_kernel(%arg0: memref<8x16xf32, #tpu.memory_space<vmem>>, %arg1: memref<8x32xf32, #tpu.memory_space<vmem>>, %arg2: memref<16x32xf32, #tpu.memory_space<vmem>>, %arg3: memref<32x32xf32, #tpu.memory_space<vmem>>, %arg4: memref<1x32xf32, #tpu.memory_space<vmem>>, %arg5: memref<1x32xf32, #tpu.memory_space<vmem>>, %arg6: memref<1x1xf32, #tpu.memory_space<smem>>, %arg7: memref<8x1xf32, #tpu.memory_space<vmem>>) attributes {dimension_semantics = [], scalar_prefetch = 0 : i64, scratch_operands = 0 : i64, tpu.core_type = #tpu.core_type<tc>} {
    %c0 = arith.constant 0 : index
    %c0_0 = arith.constant 0 : index
    %0 = vector.load %arg0[%c0, %c0_0] : memref<8x16xf32, #tpu.memory_space<vmem>>, vector<8x16xf32>
    %c0_1 = arith.constant 0 : index
    %c0_2 = arith.constant 0 : index
    %1 = vector.load %arg2[%c0_1, %c0_2] : memref<16x32xf32, #tpu.memory_space<vmem>>, vector<16x32xf32>
    %cst = arith.constant dense<0.000000e+00> : vector<8x32xf32>
    %2 = tpu.matmul %0, %1, %cst {dimension_numbers = #tpu.dot_dimension_numbers<[1], [0], [0], [1], [0, 0, 1, 1], [], []>} : vector<8x16xf32>, vector<16x32xf32>, vector<8x32xf32> -> vector<8x32xf32>
    %c0_3 = arith.constant 0 : index
    %c0_4 = arith.constant 0 : index
    %3 = vector.load %arg1[%c0_3, %c0_4] : memref<8x32xf32, #tpu.memory_space<vmem>>, vector<8x32xf32>
    %c0_5 = arith.constant 0 : index
    %c0_6 = arith.constant 0 : index
    %4 = vector.load %arg3[%c0_5, %c0_6] : memref<32x32xf32, #tpu.memory_space<vmem>>, vector<32x32xf32>
    %cst_7 = arith.constant dense<0.000000e+00> : vector<8x32xf32>
    %5 = tpu.matmul %3, %4, %cst_7 {dimension_numbers = #tpu.dot_dimension_numbers<[1], [0], [0], [1], [0, 0, 1, 1], [], []>} : vector<8x32xf32>, vector<32x32xf32>, vector<8x32xf32> -> vector<8x32xf32>
    %6 = arith.addf %2, %5 : vector<8x32xf32>
    %c0_8 = arith.constant 0 : index
    %c0_9 = arith.constant 0 : index
    %7 = vector.load %arg4[%c0_8, %c0_9] : memref<1x32xf32, #tpu.memory_space<vmem>>, vector<1x32xf32>
    %8 = vector.broadcast %7 : vector<1x32xf32> to vector<8x32xf32>
    %9 = arith.addf %6, %8 : vector<8x32xf32>
    %10 = math.tanh %9 : vector<8x32xf32>
    %c0_10 = arith.constant 0 : index
    %c0_11 = arith.constant 0 : index
    %11 = vector.load %arg5[%c0_10, %c0_11] : memref<1x32xf32, #tpu.memory_space<vmem>>, vector<1x32xf32>
    %12 = vector.broadcast %11 : vector<1x32xf32> to vector<8x32xf32>
    %13 = arith.mulf %10, %12 : vector<8x32xf32>
    %cst_12 = arith.constant dense<0.000000e+00> : vector<8xf32>
    %14 = vector.multi_reduction <add>, %13, %cst_12 [1] : vector<8x32xf32> to vector<8xf32>
    %15 = vector.shape_cast %14 : vector<8xf32> to vector<8x1xf32>
    %c0_13 = arith.constant 0 : index
    %c0_14 = arith.constant 0 : index
    %16 = memref.load %arg6[%c0_13, %c0_14] : memref<1x1xf32, #tpu.memory_space<smem>>
    %17 = vector.broadcast %16 : f32 to vector<8x1xf32>
    %18 = arith.addf %15, %17 : vector<8x1xf32>
    %19 = arith.negf %18 : vector<8x1xf32>
    %20 = math.exp %19 : vector<8x1xf32>
    %cst_15 = arith.constant 1.000000e+00 : f32
    %21 = vector.broadcast %cst_15 : f32 to vector<8x1xf32>
    %22 = arith.addf %21, %20 : vector<8x1xf32>
    %23 = arith.divf %21, %22 : vector<8x1xf32>
    %c0_16 = arith.constant 0 : index
    %c0_17 = arith.constant 0 : index
    %24 = vector.load %arg7[%c0_16, %c0_17] : memref<8x1xf32, #tpu.memory_space<vmem>>, vector<8x1xf32>
    tpu.vector_store %arg7[%c0_16, %c0_17], %23 {strides = array<i32>} : memref<8x1xf32, #tpu.memory_space<vmem>>, vector<8x1xf32>,
    return
  }
}

</mosaic_0001>

<bundles_post_ra>
// kernel: tpu_custom_call.1
= control target key start
LH: loop header
LB: loop body
LE: loop exit
PB: predicated region body
PF: predicated region fallthrough
CT: control target
= control target key end

     0   :  { %13 = vsyncpa [#allocation4], 0  ;;  %s530_s0 = inlined_call_operand.hbm [shape: f32[8,16], index: 0, kind: input, shape index: {}]   ;;  %s531_s1 = inlined_call_operand.hbm [shape: f32[8,32], index: 1, kind: input, shape index: {}]   ;;  %s532_s2 = inlined_call_operand.hbm [shape: f32[16,32], index: 2, kind: input, shape index: {}]   ;;  %s533_s3 = inlined_call_operand.hbm [shape: f32[32,32], index: 3, kind: input, shape index: {}]   ;;  %s534_s4 = inlined_call_operand.vmem [shape: f32[1,32], index: 4, kind: input, shape index: {}]   ;;  %s535_s5 = inlined_call_operand.vmem [shape: f32[1,32], index: 5, kind: input, shape index: {}]   ;;  %s536_s6 = inlined_call_operand.<no memory space> [shape: f32[1,1], index: 6, kind: input, shape index: {}]   ;;  %s537_s7 = inlined_call_operand.vmem [shape: f32[8,1], index: 7, kind: output, shape index: {}]  }
   0x1   :  { %14 = vsyncpa [#allocation6], 0 }
   0x2   :  { %15 = vsyncpa [#allocation9], 0  ;;  %s421_s24 = smov [#allocation5]   ;;  %s422_s26 = smov [#allocation3]  }
   0x3   :  { %s32_s25 = sshll.u32 %s421_s24, 4  ;;  %s22_s27 = sshll.u32 %s422_s26, 4  ;;  %s33_s25 = int_to_ptr.vmem [resolvable:$true] %s32_s25  ;;  %s23_s27 = int_to_ptr.vmem [resolvable:$true] %s22_s27 }
   0x4   :  { %s327_s30 = scalar_lea.hbm %s531_s1, 128 }
   0x5   :  { %p328_p0 = scmp.ne.s32.totalorder %s531_s1, %s327_s30  ;;  %p331_p1 = scmp.lt.u32.totalorder %s327_s30, %s531_s1 }
   0x7   :  { %p333_p2 = pnand %p331_p1, %p328_p0 }
   0x9   :  { %336 = shalt.err (!%p333_p2)
}
   0xa   :  { %s337_s12 = scalar_lea.vmem %s33_s25, 128  ;;  %p342_p4 = scmp.lt.s32.totalorder %s33_s25, %s33_s25 }
   0xb   :  { %p338_p3 = scmp.ne.s32.totalorder %s33_s25, %s337_s12  ;;  %p343_p5 = scmp.lt.s32.totalorder %s337_s12, %s337_s12 }
   0xd   :  { %p344_p6 = por %p343_p5, %p342_p4 }
   0xf   :  { %p345_p7 = pnand %p344_p6, %p338_p3 }
  0x11   :  { %348 = shalt.err (!%p345_p7)
}
  0x12   :  { %35 = dma.hbm_to_vmem [thread:$0]  %s531_s1, 128, %s33_s25, [#allocation6]  }
  0x13   :  { %s349_s17 = scalar_lea.hbm %s530_s0, 128 }
  0x14   :  { %p350_p8 = scmp.ne.s32.totalorder %s530_s0, %s349_s17  ;;  %p353_p9 = scmp.lt.u32.totalorder %s349_s17, %s530_s0 }
  0x16   :  { %p355_p10 = pnand %p353_p9, %p350_p8 }
  0x18   :  { %358 = shalt.err (!%p355_p10)
}
  0x19   :  { %s359_s22 = scalar_lea.vmem %s23_s27, 128  ;;  %p364_p12 = scmp.lt.s32.totalorder %s23_s27, %s23_s27 }
  0x1a   :  { %p360_p11 = scmp.ne.s32.totalorder %s23_s27, %s359_s22  ;;  %p365_p13 = scmp.lt.s32.totalorder %s359_s22, %s359_s22 }
  0x1c   :  { %p366_p0 = por %p365_p13, %p364_p12 }
  0x1e   :  { %p367_p1 = pnand %p366_p0, %p360_p11 }
  0x20   :  { %370 = shalt.err (!%p367_p1)
}
  0x21   :  { %25 = dma.hbm_to_vmem [thread:$0]  %s530_s0, 128, %s23_s27, [#allocation4]  }
  0x22   :  { %s423_s24 = smov [#allocation7]   ;;  %s371_s29 = scalar_lea.hbm %s532_s2, 256 }
  0x23   :  { %s41_s25 = sshll.u32 %s423_s24, 4  ;;  %p372_p2 = scmp.ne.s32.totalorder %s532_s2, %s371_s29  ;;  %s42_s25 = int_to_ptr.vmem [resolvable:$true] %s41_s25 }
  0x24   :  { %p375_p3 = scmp.lt.u32.totalorder %s371_s29, %s532_s2 }
  0x26   :  { %p377_p4 = pnand %p375_p3, %p372_p2 }
  0x28   :  { %380 = shalt.err (!%p377_p4)
}
  0x29   :  { %s381_s11 = scalar_lea.vmem %s42_s25, 256  ;;  %p386_p6 = scmp.lt.s32.totalorder %s42_s25, %s42_s25 }
  0x2a   :  { %p382_p5 = scmp.ne.s32.totalorder %s42_s25, %s381_s11  ;;  %p387_p7 = scmp.lt.s32.totalorder %s381_s11, %s381_s11 }
  0x2c   :  { %p388_p8 = por %p387_p7, %p386_p6 }
  0x2e   :  { %p389_p9 = pnand %p388_p8, %p382_p5 }
  0x30   :  { %392 = shalt.err (!%p389_p9)
}
  0x31   :  { %s424_s0 = smov 128   ;;  %s425_s27 = smov 8  }
  0x32   :  { %47 = dma.hbm_to_vmem [thread:$0]  %s532_s2, 256, %s42_s25, [#allocation6], %s424_s0, %s424_s0, %s425_s27  }
  0x33   :  { %s426_s14 = smov [#allocation8]   ;;  %s393_s18 = scalar_lea.hbm %s533_s3, 512 }
  0x34   :  { %s53_s15 = sshll.u32 %s426_s14, 4  ;;  %p394_p10 = scmp.ne.s32.totalorder %s533_s3, %s393_s18  ;;  %s54_s15 = int_to_ptr.vmem [resolvable:$true] %s53_s15 }
  0x35   :  { %p397_p11 = scmp.lt.u32.totalorder %s393_s18, %s533_s3 }
  0x37   :  { %p399_p12 = pnand %p397_p11, %p394_p10 }
  0x39   :  { %402 = shalt.err (!%p399_p12)
}
  0x3a   :  { %s403_s1 = scalar_lea.vmem %s54_s15, 512  ;;  %p408_p0 = scmp.lt.s32.totalorder %s54_s15, %s54_s15 }
  0x3b   :  { %p404_p13 = scmp.ne.s32.totalorder %s54_s15, %s403_s1  ;;  %p409_p1 = scmp.lt.s32.totalorder %s403_s1, %s403_s1 }
  0x3d   :  { %p410_p2 = por %p409_p1, %p408_p0 }
  0x3f   :  { %p411_p3 = pnand %p410_p2, %p404_p13 }
  0x41   :  { %414 = shalt.err (!%p411_p3)
}
  0x42   :  { %59 = dma.hbm_to_vmem [thread:$0]  %s533_s3, 512, %s54_s15, [#allocation9], %s424_s0, %s424_s0, %s425_s27  }
  0x43   :  { %415 = dma.done.wait [#allocation4], 128  }
  0x44   :  { %416 = vsyncadd [#allocation4], 4294967168 }
  0x45   :  { %417 = dma.done.wait [#allocation6], 384  }
  0x46   :  { %418 = vsyncadd [#allocation6], 4294966912 }
  0x47   :  { %419 = dma.done.wait [#allocation9], 512  }
  0x48   :  { %420 = vsyncadd [#allocation9], 4294966784  ;;  %v427_v0 = vmov 0.0|0.0   ;;  %vm428_vm0 = vmmov 0   ;;  %v429_v1 = vmov 0.0   ;;  %v82_v2 = vld [vmem:[#allocation8] sm:$0xff]  ;;  %v255_v24 = vstv %s536_s6 }
  0x49   :  { %303 = vmatprep.subr.bf16.mxu0 %v427_v0  ;;  %309 = vmatprep.subr.bf16.mxu1 %v427_v0  ;;  %v83_v3 = vld [vmem:[#allocation8 + $0x8] sm:$0xff]  ;;  %v79_v4 = vld [vmem:[#allocation7] sm:$0xff]  ;;  %v80_v6 = vld [vmem:[#allocation7 + $0x8] sm:$0xff]  ;;  %vm160_vm1 = vcmask 130048   ;;  %vm86_vm2 = vcmask 261120   ;;  %vm263_vm3 = vcmask 7168  }
  0x4a   :  { %300 = vmatprep.mubr.msk.f32.mxu1 %vm428_vm0, %v429_v1  ;;  %293 = vmatprep.mubr.msk.f32.mxu0 %vm428_vm0, %v429_v1  ;;  %v304_v5 = vpack.c.bf16 %v83_v3, %v82_v2  ;;  %v84_v7 = vld [vmem:[#allocation8 + $0x10] sm:$0xff]  ;;  %v85_v8 = vld [vmem:[#allocation8 + $0x18] sm:$0xff]  ;;  %v310_v9 = vpack.c.bf16 %v80_v6, %v79_v4  ;;  %v78_v11 = vld [vmem:[#allocation3] sm:$0xff] }
  0x4b   :  { %v307_v10 = vpack.c.bf16 %v85_v8, %v84_v7  ;;  %v81_v12 = vld [vmem:[#allocation5] sm:$0xff]  ;;  %v274_v16 = vld [vmem:[%s534_s4] ss:$0 sm:$0xff] }
  0x4c   :  { %305 = vmatpush3.bf16.msra.mxu0 %v304_v5  ;;  %311 = vmatpush3.bf16.msra.mxu1 %v310_v9  ;;  %v275_v20 = vld [vmem:[%s535_s5] ss:$0 sm:$0xff] }
  0x4d   :  { %306 = vmatprep.subr.bf16.mxu0 %v427_v0 }
  0x4f   :  { %301 = vmatmul.mubr.msk.f32.vlgmr.msra.gmra.mrb[0].mxu1 %vm160_vm1, %v78_v11 }
  0x50   :  { %308 = vmatpush3.bf16.msra.mxu0 %v307_v10 }
  0x53   :  { %294 = vmatmul.mubr.msk.f32.vlgmr.msra.gmra.mrb[0].mxu0 %vm86_vm2, %v81_v12 }
 0x122   :  { %v230_v13 = vpop.f32.mrb[0].mxu1 }
 0x123   :  { %v302_v14 = vpop.f32.mrb[1].mxu1 }
 0x126   :  { %v156_v15 = vpop.f32.mrb[0].mxu0 }
 0x127   :  { %v231_v17 = vadd.f32 %v230_v13, %v156_v15  ;;  %v295_v18 = vpop.f32.mrb[1].mxu0 }
 0x129   :  { %v241_v19 = vadd.f32 %v274_v16, %v231_v17 }
 0x12b   :  { %321 = vtanh.f32 %v241_v19 }
 0x135   :  { %v322_v21 = vpop.eup %321 }
 0x136   :  { %v250_v22 = vmul.f32 %v322_v21, %v275_v20 }
 0x138   :  { %v251_v23 = vsel %vm86_vm2, %v250_v22, 0.0 }
 0x139   :  { %252 = vadd.xlane.f32.xlu0 %v251_v23 }
 0x1c6   :  { %v253_v25 = vpop.xlane.xlu0 %252 }
 0x1c7   :  { %v256_v26 = vadd.f32 %v255_v24, %v253_v25 }
 0x1c9   :  { %v276_v27 = vmul.f32 -1.442695, %v256_v26 }
 0x1cb   :  { %323 = vpow2.f32 %v276_v27 }
 0x1d5   :  { %v324_v28 = vpop.eup %323 }
 0x1d6   :  { %v260_v29 = vadd.f32 1.0, %v324_v28 }
 0x1d8   :  { %325 = vrcp.f32 %v260_v29 }
 0x1e2   :  { %v326_v30 = vpop.eup %325 }
 0x1e3   :  { %264 = vst.msk [vmem:[%s537_s7] sm:$0xff] %vm263_vm3, %v326_v30 }
 0x1e4   :  { %269 = vsyncpa [#allocation4], 1 }
 0x1e5   :  { %270 = vsyncpa [#allocation6], 1 }
 0x1e6   :  { %271 = vsyncpa [#allocation9], 1 }

</bundles_post_ra>
